<compile_context>
chip_gen: v7x
topology: tpu7x:2x2x1
jax: 0.10.0
libtpu: 0.0.40
codegen_flags: <defaults>
</compile_context>

<pallas_src>
import jax
import jax.numpy as jnp
from jax.experimental import pallas as pl
from jax.experimental.pallas import tpu as pltpu


def _identity_kernel(x_ref, o_ref):
    # TODO(synk): if fused RMSNorm semantics were ever desired, this is where
    #   x * rsqrt(mean(x^2, -1) + eps) * weight (reduction in f32) would go;
    #   the reference forward does NOT do that, so we faithfully copy.
    o_ref[...] = x_ref[...]


def _pick_block_rows(rows, hidden, dtype, target_tile_bytes):
    """Dtype-aware tile-row selection.

    - sublane multiple: 8 (f32), 16 (bf16), 32 (int8/fp8) for full vreg packing
    - tile capped at `target_tile_bytes` so 2-in + 2-out double buffers fit the
      scoped VMEM limit on every generation (v7x has only 64 MiB physical VMEM)
    - prefers a block_rows that divides `rows` exactly, avoiding a padded,
      partially-masked final tile.
    """
    itemsize = jnp.dtype(dtype).itemsize
    sublane = max(8, 32 // itemsize)
    max_rows = max(sublane, target_tile_bytes // (hidden * itemsize))
    if rows <= max_rows:
        return rows  # whole array as a single block (full-extent dims are OK)
    block_rows = (max_rows // sublane) * sublane
    for cand in range(block_rows, 0, -sublane):  # prefer an exact divisor
        if rows % cand == 0:
            return cand
    return block_rows  # fall back: last tile is padded/masked by Pallas


def exllama_rmsnorm_forward(hidden_states, weight, eps, *,
                            use_pallas_copy=False,
                            target_tile_bytes=4 * 1024 * 1024):
    """ExLlamaRMSNorm.forward: returns hidden_states unchanged.

    `weight` / `eps` are carried for parity with the module's __init__ but —
    exactly as in the reference forward — are not applied.

    Default (use_pallas_copy=False): return the input directly; an identity
    needs no kernel launch and no HBM traffic (the optimal implementation).
    Set use_pallas_copy=True to materialize a fresh buffer via a tiled Pallas
    copy running at the HBM roofline.
    """
    del weight, eps  # forward() ignores them in the reference module
    if not use_pallas_copy:
        return hidden_states

    B, S, H = hidden_states.shape
    rows = B * S
    x2d = hidden_states.reshape(rows, H)
    block_rows = _pick_block_rows(rows, H, hidden_states.dtype,
                                  target_tile_bytes)
    grid = (pl.cdiv(rows, block_rows),)

    out = pl.pallas_call(
        _identity_kernel,
        out_shape=jax.ShapeDtypeStruct((rows, H), hidden_states.dtype),
        grid=grid,
        in_specs=[pl.BlockSpec((block_rows, H), lambda i: (i, 0))],
        out_specs=pl.BlockSpec((block_rows, H), lambda i: (i, 0)),
        compiler_params=pltpu.CompilerParams(
            # "parallel" lets v7x shard the row axis across its 2 TensorCores;
            # cosmetic (but harmless) on single-TC v5e/v6e.
            dimension_semantics=("parallel",),
            # 2-in + 2-out double buffers at <= ~4 MiB/tile fit comfortably;
            # this also raises v5e's 16 MiB scoped default.
            vmem_limit_bytes=32 * 1024 * 1024,
        ),
        # NOTE: under jit, callers wanting an in-place copy can additionally
        # pass input_output_aliases={0: 0} to drop the extra HBM allocation.
    )(x2d)
    return out.reshape(B, S, H)


if __name__ == "__main__":
    key = jax.random.PRNGKey(0)
    eps = 1e-6

    # Case 1: small f32 input — single-block path.
    B, S, H = 2, 8, 128
    kx, kw, k2 = jax.random.split(key, 3)
    hidden_states = jax.random.normal(kx, (B, S, H), dtype=jnp.float32)
    # deterministic "checkpoint" weight, shape [hidden] per RMSNorm convention
    weight = jax.random.normal(kw, (H,), dtype=jnp.float32)

    out_fast = exllama_rmsnorm_forward(hidden_states, weight, eps)
    out_kernel = exllama_rmsnorm_forward(hidden_states, weight, eps,
                                         use_pallas_copy=True)
    out_kernel = jax.block_until_ready(out_kernel)

    assert out_fast.shape == hidden_states.shape
    assert out_fast.dtype == hidden_states.dtype
    assert bool(jnp.all(out_fast == hidden_states))
    assert out_kernel.shape == hidden_states.shape
    assert out_kernel.dtype == hidden_states.dtype
    assert bool(jnp.all(out_kernel == hidden_states))

    # Case 2: bf16, rows not a multiple of block_rows — exercises the tiled
    # multi-step grid with a masked partial final tile (tiny target tile
    # bytes force >1 grid step even at this small size).
    B2, S2, H2 = 3, 11, 128
    hs2 = jax.random.normal(k2, (B2, S2, H2), dtype=jnp.bfloat16)
    w2 = jnp.ones((H2,), dtype=jnp.bfloat16)
    out2 = exllama_rmsnorm_forward(hs2, w2, eps, use_pallas_copy=True,
                                   target_tile_bytes=8 * 1024)
    out2 = jax.block_until_ready(out2)
    assert out2.shape == hs2.shape and out2.dtype == hs2.dtype
    assert bool(jnp.all(out2 == hs2))

    print("KERNEL_OK")
</pallas_src>

<mosaic_0001>
module attributes {stable_mosaic.version = 11 : i64} {
  func.func @_identity_kernel(%arg0: i32, %arg1: memref<16x128xf32, #tpu.memory_space<vmem>>, %arg2: memref<16x128xf32, #tpu.memory_space<vmem>>) attributes {dimension_semantics = [#tpu.dimension_semantics<parallel>], iteration_bounds = array<i64: 1>, scalar_prefetch = 0 : i64, scratch_operands = 0 : i64, tpu.core_type = #tpu.core_type<tc>, window_params = [{transform_indices = @transform_0, window_bounds = array<i64: 16, 128>}, {transform_indices = @transform_1, window_bounds = array<i64: 16, 128>}]} {
    %c0 = arith.constant 0 : index
    %c0_0 = arith.constant 0 : index
    %0 = vector.load %arg1[%c0, %c0_0] : memref<16x128xf32, #tpu.memory_space<vmem>>, vector<16x128xf32>
    %c0_1 = arith.constant 0 : index
    %c0_2 = arith.constant 0 : index
    %1 = vector.load %arg2[%c0_1, %c0_2] : memref<16x128xf32, #tpu.memory_space<vmem>>, vector<16x128xf32>
    tpu.vector_store %arg2[%c0_1, %c0_2], %0 {strides = array<i32>} : memref<16x128xf32, #tpu.memory_space<vmem>>, vector<16x128xf32>,
    return
  }
  func.func @transform_0(%arg0: i32) -> (i32, i32) {
    %c0_i32 = arith.constant 0 : i32
    %c0_i32_0 = arith.constant 0 : i32
    return %arg0, %c0_i32 : i32, i32
  }
  func.func @transform_1(%arg0: i32) -> (i32, i32) {
    %c0_i32 = arith.constant 0 : i32
    %c0_i32_0 = arith.constant 0 : i32
    return %arg0, %c0_i32 : i32, i32
  }
}

</mosaic_0001>

<bundles_post_ra>
// kernel: tpu_custom_call.1
= control target key start
LH: loop header
LB: loop body
LE: loop exit
PB: predicated region body
PF: predicated region fallthrough
CT: control target
= control target key end

     0   :  { %6 = vsyncpa [#allocation3], 0  ;;  %s134_s0 = inlined_call_operand.hbm [shape: f32[16,128], index: 0, kind: input, shape index: {}]   ;;  %s135_s1 = inlined_call_operand.hbm [shape: f32[16,128], index: 1, kind: output, shape index: {}]  }
   0x1   :  { %7 = vsyncpa [#allocation4], 0  ;;  %s96_s6 = smov [#allocation2]   ;;  %s48_s10 = scalar_lea.hbm %s134_s0, 256 }
   0x2   :  { %s13_s7 = sshll.u32 %s96_s6, 4  ;;  %p49_p0 = scmp.ne.s32.totalorder %s134_s0, %s48_s10  ;;  %s14_s7 = int_to_ptr.vmem [resolvable:$true] %s13_s7 }
   0x3   :  { %p52_p1 = scmp.lt.u32.totalorder %s48_s10, %s134_s0 }
   0x5   :  { %p54_p2 = pnand %p52_p1, %p49_p0 }
   0x7   :  { %57 = shalt.err (!%p54_p2)
}
   0x8   :  { %s58_s15 = scalar_lea.vmem %s14_s7, 256  ;;  %p63_p4 = scmp.lt.s32.totalorder %s14_s7, %s14_s7 }
   0x9   :  { %p59_p3 = scmp.ne.s32.totalorder %s14_s7, %s58_s15  ;;  %p64_p5 = scmp.lt.s32.totalorder %s58_s15, %s58_s15 }
   0xb   :  { %p65_p6 = por %p64_p5, %p63_p4 }
   0xd   :  { %p66_p7 = pnand %p65_p6, %p59_p3 }
   0xf   :  { %69 = shalt.err (!%p66_p7)
}
  0x10   :  { %s97_s16 = smov 128   ;;  %s98_s17 = smov 8  }
  0x11   :  { %19 = dma.hbm_to_vmem [thread:$0]  %s134_s0, 256, %s14_s7, [#allocation3], %s97_s16, %s97_s16, %s98_s17  }
  0x12   :  { %92 = dma.done.wait [#allocation3], 256  }
  0x13   :  { %93 = vsyncadd [#allocation3], 4294967040  ;;  %s99_s20 = smov [#allocation5]   ;;  %v23_v0 = vld [vmem:[#allocation2] sm:$0xff]  ;;  %v24_v1 = vld [vmem:[#allocation2 + $0x8] sm:$0xff] }
  0x14   :  { %s32_s21 = sshll.u32 %s99_s20, 4  ;;  %25 = vst [vmem:[#allocation5] sm:$0xff] %v23_v0  ;;  %26 = vst [vmem:[#allocation5 + $0x8] sm:$0xff] %v24_v1  ;;  %s33_s21 = int_to_ptr.vmem [resolvable:$true] %s32_s21 }
  0x15   :  { %s70_s22 = scalar_lea.vmem %s33_s21, 256  ;;  %p75_p9 = scmp.lt.s32.totalorder %s33_s21, %s33_s21 }
  0x16   :  { %p71_p8 = scmp.ne.s32.totalorder %s33_s21, %s70_s22  ;;  %p76_p10 = scmp.lt.s32.totalorder %s70_s22, %s70_s22 }
  0x18   :  { %p77_p11 = por %p76_p10, %p75_p9 }
  0x1a   :  { %p78_p12 = pnand %p77_p11, %p71_p8 }
  0x1c   :  { %81 = shalt.err (!%p78_p12)
}
  0x1d   :  { %s82_s0 = scalar_lea.hbm %s135_s1, 256 }
  0x1e   :  { %p83_p13 = scmp.ne.s32.totalorder %s135_s1, %s82_s0  ;;  %p86_p0 = scmp.lt.u32.totalorder %s82_s0, %s135_s1 }
  0x20   :  { %p88_p1 = pnand %p86_p0, %p83_p13 }
  0x22   :  { %91 = shalt.err (!%p88_p1)
}
  0x23   :  { %38 = dma.vmem_to_hbm [thread:$0]  %s33_s21, 256, %s135_s1, [#allocation4], %s97_s16, %s97_s16, %s98_s17  }
  0x24   :  { %94 = dma.done.wait [#allocation4], 256  }
  0x25   :  { %95 = vsyncadd [#allocation4], 4294967040 }
  0x26   :  { %42 = vsyncpa [#allocation3], 1 }
  0x27   :  { %43 = vsyncpa [#allocation4], 1 }

</bundles_post_ra>
